<compile_context>
chip_gen: v7x
topology: tpu7x:2x2x1
jax: 0.10.0
libtpu: 0.0.40
codegen_flags: <defaults>
</compile_context>

<pallas_src>
import functools

import jax
import jax.numpy as jnp
from jax.experimental import pallas as pl
from jax.experimental.pallas import tpu as pltpu

_LANE = 128
_MAX_BLOCK_ROWS = 2048  # 2048 x 128 f32 block = 1 MiB; 4 MiB double-buffered in+out.


def _tanh_flow_kernel(params_ref, f0_ref, out_ref, *, add_init_f0):
    # params_ref (SMEM): [a, b_eff, c, 1/d_eff]  (softplus + reciprocal applied
    # in the wrapper; matches TanhFlow parameter setup with set_restrictions).
    a = params_ref[0]
    b = params_ref[1]
    c = params_ref[2]
    inv_d = params_ref[3]
    # Stream native-width data from HBM, upcast in-vreg (halves DMA for bf16).
    f0 = f0_ref[...].astype(jnp.float32)
    fk = a + b * jnp.tanh((f0 - c) * inv_d)
    if add_init_f0:
        fk = fk + f0
    out_ref[...] = fk.astype(out_ref.dtype)


def tanh_flow_forward(f0, a, b, c, d, *, add_init_f0, set_restrictions,
                      max_block_rows=_MAX_BLOCK_ROWS):
    """JAX/Pallas equivalent of TanhFlow.forward (non input-dependent branch)."""
    # TODO(synk): input_dependent=True branch (per-point MLP / BNN predicted
    # a,b,c,d with MC-dropout or mean-field VI) is not implemented here.
    if add_init_f0:
        set_restrictions = True

    a = jnp.asarray(a, jnp.float32)
    b = jnp.asarray(b, jnp.float32)
    c = jnp.asarray(c, jnp.float32)
    d = jnp.asarray(d, jnp.float32)
    if set_restrictions:
        b = jax.nn.softplus(b)
        d = jax.nn.softplus(d)
    inv_d = 1.0 / d
    params = jnp.stack([a, b, c, inv_d])  # (4,) f32 -> SMEM

    orig_shape = f0.shape
    orig_dtype = f0.dtype
    flat = f0.reshape(-1)  # native dtype; upcast happens in-vreg in the kernel
    n = flat.shape[0]

    # Static (Python-level) layout choice: lane-dense (rows, 128) slab.
    rows = pl.cdiv(n, _LANE)
    if rows <= max_block_rows:
        block_rows = max(rows, 1)   # full-extent block is always a legal shape
        grid_rows = 1
    else:
        block_rows = max_block_rows  # multiple of 8 -> legal sublane tiling
        grid_rows = pl.cdiv(rows, block_rows)
    padded_rows = grid_rows * block_rows
    n_pad = padded_rows * _LANE

    needs_pad = (n_pad != n)
    if needs_pad:
        # Rare ragged case only; common shapes (multiples of 128) skip this copy.
        flat = jnp.pad(flat, (0, n_pad - n))
    x2d = flat.reshape(padded_rows, _LANE)

    # TODO(synk): on v7x, gate the leading grid axis to pltpu.CORE_PARALLEL to
    # shard the stream across both TensorCores of the chip.
    out2d = pl.pallas_call(
        functools.partial(_tanh_flow_kernel, add_init_f0=add_init_f0),
        out_shape=jax.ShapeDtypeStruct((padded_rows, _LANE), orig_dtype),
        grid=(grid_rows,),
        in_specs=[
            pl.BlockSpec(memory_space=pltpu.MemorySpace.SMEM),       # params
            pl.BlockSpec((block_rows, _LANE), lambda i: (i, 0)),      # f0 tile
        ],
        out_specs=pl.BlockSpec((block_rows, _LANE), lambda i: (i, 0)),
        compiler_params=pltpu.CompilerParams(
            dimension_semantics=("parallel",),
        ),
    )(params, x2d)

    out = out2d.reshape(-1)
    if needs_pad:
        out = out[:n]
    return out.reshape(orig_shape)


def _reference_forward(f0, a, b, c, d, *, add_init_f0, set_restrictions):
    """Pure-JAX reference mirroring the PyTorch forward."""
    if add_init_f0:
        set_restrictions = True
    b = jnp.asarray(b, jnp.float32)
    d = jnp.asarray(d, jnp.float32)
    if set_restrictions:
        b = jax.nn.softplus(b)
        d = jax.nn.softplus(d)
    fk = a + b * jnp.tanh((f0.astype(jnp.float32) - c) / d)
    if add_init_f0:
        fk = fk + f0
    return fk.astype(f0.dtype)


if __name__ == "__main__":
    # Deterministic parameter init (matches TanhFlow.__init__ scalar params).
    init_a, init_b, init_c, init_d = 0.1, 0.5, -0.2, 0.8
    add_init_f0 = True          # forces set_restrictions = True, as in the module
    set_restrictions = False

    key = jax.random.PRNGKey(0)
    f0 = jax.random.normal(key, (2, 4, 16, 16), dtype=jnp.float32)

    out = tanh_flow_forward(
        f0, init_a, init_b, init_c, init_d,
        add_init_f0=add_init_f0, set_restrictions=set_restrictions,
    )
    out = jax.block_until_ready(out)

    ref = _reference_forward(
        f0, init_a, init_b, init_c, init_d,
        add_init_f0=add_init_f0, set_restrictions=set_restrictions,
    )
    assert out.shape == f0.shape and out.dtype == f0.dtype
    assert jnp.allclose(out, ref, atol=1e-5, rtol=1e-5)

    print("KERNEL_OK")
</pallas_src>

<mosaic_0001>
module attributes {stable_mosaic.version = 11 : i64} {
  func.func @_tanh_flow_kernel(%arg0: i32, %arg1: memref<4xf32, #tpu.memory_space<smem>>, %arg2: memref<16x128xf32, #tpu.memory_space<vmem>>, %arg3: memref<16x128xf32, #tpu.memory_space<vmem>>) attributes {dimension_semantics = [#tpu.dimension_semantics<parallel>], iteration_bounds = array<i64: 1>, scalar_prefetch = 0 : i64, scratch_operands = 0 : i64, tpu.core_type = #tpu.core_type<tc>, window_params = [{transform_indices = @transform_0, window_bounds = array<i64: 4>}, {transform_indices = @transform_1, window_bounds = array<i64: 16, 128>}, {transform_indices = @transform_2, window_bounds = array<i64: 16, 128>}]} {
    %c0 = arith.constant 0 : index
    %0 = memref.load %arg1[%c0] : memref<4xf32, #tpu.memory_space<smem>>
    %c1 = arith.constant 1 : index
    %1 = memref.load %arg1[%c1] : memref<4xf32, #tpu.memory_space<smem>>
    %c2 = arith.constant 2 : index
    %2 = memref.load %arg1[%c2] : memref<4xf32, #tpu.memory_space<smem>>
    %c3 = arith.constant 3 : index
    %3 = memref.load %arg1[%c3] : memref<4xf32, #tpu.memory_space<smem>>
    %c0_0 = arith.constant 0 : index
    %c0_1 = arith.constant 0 : index
    %4 = vector.load %arg2[%c0_0, %c0_1] : memref<16x128xf32, #tpu.memory_space<vmem>>, vector<16x128xf32>
    %5 = vector.broadcast %2 : f32 to vector<16x128xf32>
    %6 = arith.subf %4, %5 : vector<16x128xf32>
    %7 = vector.broadcast %3 : f32 to vector<16x128xf32>
    %8 = arith.mulf %6, %7 : vector<16x128xf32>
    %9 = math.tanh %8 : vector<16x128xf32>
    %10 = vector.broadcast %1 : f32 to vector<16x128xf32>
    %11 = arith.mulf %10, %9 : vector<16x128xf32>
    %12 = vector.broadcast %0 : f32 to vector<16x128xf32>
    %13 = arith.addf %12, %11 : vector<16x128xf32>
    %14 = arith.addf %13, %4 : vector<16x128xf32>
    %c0_2 = arith.constant 0 : index
    %c0_3 = arith.constant 0 : index
    %15 = vector.load %arg3[%c0_2, %c0_3] : memref<16x128xf32, #tpu.memory_space<vmem>>, vector<16x128xf32>
    tpu.vector_store %arg3[%c0_2, %c0_3], %14 {strides = array<i32>} : memref<16x128xf32, #tpu.memory_space<vmem>>, vector<16x128xf32>,
    return
  }
  func.func @transform_0(%arg0: i32) -> i32 {
    %c0_i32 = arith.constant 0 : i32
    %c0_i32_0 = arith.constant 0 : i32
    return %c0_i32 : i32
  }
  func.func @transform_1(%arg0: i32) -> (i32, i32) {
    %c0_i32 = arith.constant 0 : i32
    %c0_i32_0 = arith.constant 0 : i32
    return %arg0, %c0_i32 : i32, i32
  }
  func.func @transform_2(%arg0: i32) -> (i32, i32) {
    %c0_i32 = arith.constant 0 : i32
    %c0_i32_0 = arith.constant 0 : i32
    return %arg0, %c0_i32 : i32, i32
  }
}

</mosaic_0001>

<bundles_post_ra>
// kernel: tpu_custom_call.1
= control target key start
LH: loop header
LB: loop body
LE: loop exit
PB: predicated region body
PF: predicated region fallthrough
CT: control target
= control target key end

     0   :  { %7 = vsyncpa [#allocation5], 0  ;;  %s213_s0 = inlined_call_operand.hbm [shape: f32[4], index: 0, kind: input, shape index: {}]   ;;  %s214_s1 = inlined_call_operand.hbm [shape: f32[16,128], index: 1, kind: input, shape index: {}]   ;;  %s215_s2 = inlined_call_operand.hbm [shape: f32[16,128], index: 2, kind: output, shape index: {}]  }
   0x1   :  { %8 = vsyncpa [#allocation3], 0 }
   0x2   :  { %9 = vsyncpa [#allocation4], 0  ;;  %s91_s11 = scalar_lea.hbm %s213_s0, 16 }
   0x3   :  { %p92_p0 = scmp.ne.s32.totalorder %s213_s0, %s91_s11  ;;  %p95_p1 = scmp.lt.u32.totalorder %s91_s11, %s213_s0 }
   0x5   :  { %p97_p2 = pnand %p95_p1, %p92_p0 }
   0x7   :  { %100 = shalt.err (!%p97_p2)
}
   0x8   :  { %s151_s16 = smov [#allocation2]   ;;  %s152_s19 = smov [#allocation6]  }
   0x9   :  { %17 = dma.hbm_to_smem %s213_s0, 16, %s151_s16, [#allocation5]  }
   0xa   :  { %s23_s20 = sshll.u32 %s152_s19, 4  ;;  %s101_s23 = scalar_lea.hbm %s214_s1, 256  ;;  %s24_s20 = int_to_ptr.vmem [resolvable:$true] %s23_s20 }
   0xb   :  { %p102_p3 = scmp.ne.s32.totalorder %s214_s1, %s101_s23  ;;  %p105_p4 = scmp.lt.u32.totalorder %s101_s23, %s214_s1 }
   0xd   :  { %p107_p5 = pnand %p105_p4, %p102_p3 }
   0xf   :  { %110 = shalt.err (!%p107_p5)
}
  0x10   :  { %s111_s28 = scalar_lea.vmem %s24_s20, 256  ;;  %p116_p7 = scmp.lt.s32.totalorder %s24_s20, %s24_s20 }
  0x11   :  { %p112_p6 = scmp.ne.s32.totalorder %s24_s20, %s111_s28  ;;  %p117_p8 = scmp.lt.s32.totalorder %s111_s28, %s111_s28 }
  0x13   :  { %p118_p9 = por %p117_p8, %p116_p7 }
  0x15   :  { %p119_p10 = pnand %p118_p9, %p112_p6 }
  0x17   :  { %122 = shalt.err (!%p119_p10)
}
  0x18   :  { %s153_s0 = smov 128   ;;  %s154_s29 = smov 8  }
  0x19   :  { %29 = dma.hbm_to_vmem [thread:$0]  %s214_s1, 256, %s24_s20, [#allocation3], %s153_s0, %s153_s0, %s154_s29  }
  0x1a   :  { %145 = dma.done.wait [#allocation5], 16  }
  0x1b   :  { %146 = vsyncadd [#allocation5], 4294967280 }
  0x1c   :  { %147 = dma.done.wait [#allocation3], 256  }
  0x1d   :  { %148 = vsyncadd [#allocation3], 4294967040 }
  0x1e   :  { %36 = sfence }
  0x1f   :  { %s80_s4 = sld [smem:[#allocation2 + $0x2]]  ;;  %s81_s5 = sld [smem:[#allocation2 + $0x3]]  ;;  %v41_v0 = vld [vmem:[#allocation6] sm:$0xff]  ;;  %v42_v1 = vld [vmem:[#allocation6 + $0x8] sm:$0xff] }
  0x20   :  { %s79_s6 = sld [smem:[#allocation2 + $0x1]]  ;;  %s37_s7 = sld [smem:[#allocation2]] }
  0x21   :  { %s155_s1 = smov [#allocation7]  }
  0x22   :  { %s66_s8 = sshll.u32 %s155_s1, 4  ;;  %s67_s8 = int_to_ptr.vmem [resolvable:$true] %s66_s8 }
  0x23   :  { %s123_s9 = scalar_lea.vmem %s67_s8, 256  ;;  %p128_p12 = scmp.lt.s32.totalorder %s67_s8, %s67_s8 }
  0x24   :  { %p124_p11 = scmp.ne.s32.totalorder %s67_s8, %s123_s9  ;;  %p129_p13 = scmp.lt.s32.totalorder %s123_s9, %s123_s9 }
  0x25   :  { %v43_v2 = vstv %s80_s4  ;;  %v46_v3 = vstv %s81_s5 }
  0x26   :  { %v44_v4 = vsub.f32 %v41_v0, %v43_v2  ;;  %v45_v5 = vsub.f32 %v42_v1, %v43_v2  ;;  %v51_v8 = vstv %s79_s6  ;;  %v54_v10 = vstv %s37_s7  ;;  %p130_p0 = por %p129_p13, %p128_p12 }
  0x28   :  { %v47_v6 = vmul.f32 %v46_v3, %v44_v4  ;;  %v48_v7 = vmul.f32 %v46_v3, %v45_v5  ;;  %p131_p1 = pnand %p130_p0, %p124_p11 }
  0x2a   :  { %87 = vtanh.f32 %v47_v6 }
  0x2b   :  { %89 = vtanh.f32 %v48_v7 }
  0x34   :  { %v88_v9 = vpop.eup %87 }
  0x35   :  { %v90_v11 = vpop.eup %89  ;;  %v52_v12 = vmul.f32 %v88_v9, %v51_v8 }
  0x36   :  { %v53_v13 = vmul.f32 %v90_v11, %v51_v8 }
  0x37   :  { %v55_v14 = vadd.f32 %v54_v10, %v52_v12 }
  0x38   :  { %v56_v15 = vadd.f32 %v54_v10, %v53_v13 }
  0x39   :  { %v57_v16 = vadd.f32 %v55_v14, %v41_v0 }
  0x3a   :  { %v58_v17 = vadd.f32 %v56_v15, %v42_v1 }
  0x3b   :  { %59 = vst [vmem:[#allocation7] sm:$0xff] %v57_v16 }
  0x3c   :  { %60 = vst [vmem:[#allocation7 + $0x8] sm:$0xff] %v58_v17 }
  0x3d   :  { %134 = shalt.err (!%p131_p1)
}
  0x3e   :  { %s135_s12 = scalar_lea.hbm %s215_s2, 256 }
  0x3f   :  { %p136_p2 = scmp.ne.s32.totalorder %s215_s2, %s135_s12  ;;  %p139_p3 = scmp.lt.u32.totalorder %s135_s12, %s215_s2 }
  0x41   :  { %p141_p4 = pnand %p139_p3, %p136_p2 }
  0x43   :  { %144 = shalt.err (!%p141_p4)
}
  0x44   :  { %72 = dma.vmem_to_hbm [thread:$0]  %s67_s8, 256, %s215_s2, [#allocation4], %s153_s0, %s153_s0, %s154_s29  }
  0x45   :  { %149 = dma.done.wait [#allocation4], 256  }
  0x46   :  { %150 = vsyncadd [#allocation4], 4294967040 }
  0x47   :  { %76 = vsyncpa [#allocation3], 1 }
  0x48   :  { %77 = vsyncpa [#allocation4], 1 }
  0x49   :  { %78 = vsyncpa [#allocation5], 1 }

</bundles_post_ra>
